<compile_context>
chip_gen: v5e
topology: v5e:2x2
jax: 0.10.0
libtpu: 0.0.40
codegen_flags: <defaults>
</compile_context>

<pallas_src>
import functools

import jax
import jax.numpy as jnp
from jax.experimental import pallas as pl
from jax.experimental.pallas import tpu as pltpu


def mlp_kernel(x_ref, w1_ref, b1_ref, w2_ref, b2_ref, w3_ref, b3_ref, o_ref):
    """Fused 3-layer MLP: relu(x @ W1 + b1) -> relu(. @ W2 + b2) -> . @ W3 + b3.

    All matmuls on the MXU with f32 accumulation; bias add + ReLU on the VPU in f32.
    Dropout(p=0.0) is the identity and is omitted.
    """
    x = x_ref[...]                                                        # (tb, D_in) f32

    h = jnp.dot(x, w1_ref[...], preferred_element_type=jnp.float32) + b1_ref[...]
    h = jnp.maximum(h, 0.0)                                               # ReLU

    h = jnp.dot(h, w2_ref[...], preferred_element_type=jnp.float32) + b2_ref[...]
    h = jnp.maximum(h, 0.0)                                               # ReLU

    o = jnp.dot(h, w3_ref[...], preferred_element_type=jnp.float32) + b3_ref[...]
    o_ref[...] = o.astype(o_ref.dtype)                                    # (tb, D_out), no final act


def _round_up(a, m):
    return (a + m - 1) // m * m


def _choose_tile_b(B, tile_b):
    """Batch tile: multiple of 8 sublanes, capped so the grid has >=4 steps when B allows.

    >=2 grid steps let dimension_semantics=("parallel",) shard across v7x's two TensorCores
    and give the BlockSpec pipeline something to overlap; the cap at `tile_b` keeps per-step
    overhead amortized for very large batches.
    """
    cap = _round_up(pl.cdiv(B, 4), 8)          # aim for >= 4 grid steps
    return max(8, min(int(tile_b), cap))


@functools.partial(jax.jit, static_argnames=("tile_b",))
def _mlp_forward_impl(x, w1, b1, w2, b2, w3, b3, *, tile_b):
    B, D_in = x.shape
    H1 = w1.shape[1]
    H2 = w2.shape[1]
    D_out = w3.shape[1]
    out_dtype = x.dtype

    tb = _choose_tile_b(B, tile_b)
    grid = (pl.cdiv(B, tb),)                   # ragged last block handled by masked writeback

    flops = 2 * B * (D_in * H1 + H1 * H2 + H2 * D_out)
    bytes_accessed = (
        B * D_in * x.dtype.itemsize            # x tiles
        + B * D_out * jnp.dtype(out_dtype).itemsize   # output (real width, no padding)
        + (D_in * H1 + H1 * H2 + H2 * D_out) * 4      # weights (f32, fetched once)
        + (H1 + H2 + D_out) * 4                       # biases (f32)
    )

    # Weights/biases are grid-invariant (constant block index) -> fetched once, kept resident.
    full = lambda shape: pl.BlockSpec(shape, lambda i: (0, 0))

    out = pl.pallas_call(
        mlp_kernel,
        out_shape=jax.ShapeDtypeStruct((B, D_out), out_dtype),
        grid_spec=pltpu.PrefetchScalarGridSpec(
            num_scalar_prefetch=0,
            grid=grid,
            in_specs=[
                pl.BlockSpec((tb, D_in), lambda i: (i, 0)),   # x tiles stream over the batch
                full((D_in, H1)), full((1, H1)),
                full((H1, H2)), full((1, H2)),
                full((H2, D_out)), full((1, D_out)),
            ],
            out_specs=pl.BlockSpec((tb, D_out), lambda i: (i, 0)),
        ),
        compiler_params=pltpu.CompilerParams(
            dimension_semantics=("parallel",),   # batch axis shards across v7x's 2 TensorCores
        ),
        cost_estimate=pl.CostEstimate(
            flops=flops, transcendentals=0, bytes_accessed=bytes_accessed),
    )(x, w1, b1, w2, b2, w3, b3)

    return out


def mlp_forward(x, params, *, tile_b=2048):
    """Run the fused MLP kernel, tiling over the batch dimension.

    Mirrors MLP_Model.forward, which returns `[out]`.
    """
    (w1, b1), (w2, b2), (w3, b3) = params
    return [_mlp_forward_impl(x, w1, b1, w2, b2, w3, b3, tile_b=tile_b)]


def init_params(key, dims):
    """Deterministic init matching the Linear shapes implied by net_layers.

    PyTorch nn.Linear stores weight as [out, in]; we store the transpose [in, out]
    so the kernel computes x @ W + b directly.
    """
    params = []
    for d_in, d_out in zip(dims[:-1], dims[1:]):
        key, kw, kb = jax.random.split(key, 3)
        bound = 1.0 / jnp.sqrt(d_in)
        w = jax.random.uniform(kw, (d_in, d_out), jnp.float32, -bound, bound)
        b = jax.random.uniform(kb, (1, d_out), jnp.float32, -bound, bound)
        params.append((w, b))
    return params


def mlp_reference(x, params):
    """Pure-JAX f32 reference of the PyTorch forward."""
    (w1, b1), (w2, b2), (w3, b3) = params
    h = jnp.maximum(x @ w1 + b1, 0.0)
    h = jnp.maximum(h @ w2 + b2, 0.0)
    return h @ w3 + b3


if __name__ == "__main__":
    key = jax.random.PRNGKey(0)

    input_size = 32
    net_layers = [32, 32, 8]   # two hidden Linear layers + final Linear
    batch = 8

    key, kx = jax.random.split(key)
    x = jax.random.normal(kx, (batch, input_size), dtype=jnp.float32)

    params = init_params(key, [input_size] + net_layers)

    out = mlp_forward(x, params)
    jax.block_until_ready(out)

    assert isinstance(out, list) and len(out) == 1
    assert out[0].shape == (batch, net_layers[-1])
    assert out[0].dtype == x.dtype

    # Sanity check against a pure-JAX f32 reference (MXU accumulation order may differ
    # slightly from XLA's, so keep a small-but-safe tolerance).
    ref = mlp_reference(x, params)
    assert jnp.allclose(out[0], ref, atol=5e-2, rtol=5e-2)

    print("KERNEL_OK")
</pallas_src>

<mosaic_0001>
module attributes {stable_mosaic.version = 11 : i64} {
  func.func @mlp_kernel(%arg0: i32, %arg1: memref<8x32xf32, #tpu.memory_space<vmem>>, %arg2: memref<32x32xf32, #tpu.memory_space<vmem>>, %arg3: memref<1x32xf32, #tpu.memory_space<vmem>>, %arg4: memref<32x32xf32, #tpu.memory_space<vmem>>, %arg5: memref<1x32xf32, #tpu.memory_space<vmem>>, %arg6: memref<32x8xf32, #tpu.memory_space<vmem>>, %arg7: memref<1x8xf32, #tpu.memory_space<vmem>>, %arg8: memref<8x8xf32, #tpu.memory_space<vmem>>) attributes {dimension_semantics = [#tpu.dimension_semantics<parallel>], iteration_bounds = array<i64: 1>, scalar_prefetch = 0 : i64, scratch_operands = 0 : i64, tpu.core_type = #tpu.core_type<tc>, window_params = [{transform_indices = @transform_0, window_bounds = array<i64: 8, 32>}, {pipeline_mode = #tpu.pipeline_mode<synchronous>, transform_indices = @transform_1, window_bounds = array<i64: 32, 32>}, {pipeline_mode = #tpu.pipeline_mode<synchronous>, transform_indices = @transform_2, window_bounds = array<i64: 1, 32>}, {pipeline_mode = #tpu.pipeline_mode<synchronous>, transform_indices = @transform_3, window_bounds = array<i64: 32, 32>}, {pipeline_mode = #tpu.pipeline_mode<synchronous>, transform_indices = @transform_4, window_bounds = array<i64: 1, 32>}, {pipeline_mode = #tpu.pipeline_mode<synchronous>, transform_indices = @transform_5, window_bounds = array<i64: 32, 8>}, {pipeline_mode = #tpu.pipeline_mode<synchronous>, transform_indices = @transform_6, window_bounds = array<i64: 1, 8>}, {transform_indices = @transform_7, window_bounds = array<i64: 8, 8>}]} {
    %c0 = arith.constant 0 : index
    %c0_0 = arith.constant 0 : index
    %0 = vector.load %arg1[%c0, %c0_0] : memref<8x32xf32, #tpu.memory_space<vmem>>, vector<8x32xf32>
    %c0_1 = arith.constant 0 : index
    %c0_2 = arith.constant 0 : index
    %1 = vector.load %arg2[%c0_1, %c0_2] : memref<32x32xf32, #tpu.memory_space<vmem>>, vector<32x32xf32>
    %cst = arith.constant dense<0.000000e+00> : vector<8x32xf32>
    %2 = tpu.matmul %0, %1, %cst {dimension_numbers = #tpu.dot_dimension_numbers<[1], [0], [0], [1], [0, 0, 1, 1], [], []>} : vector<8x32xf32>, vector<32x32xf32>, vector<8x32xf32> -> vector<8x32xf32>
    %c0_3 = arith.constant 0 : index
    %c0_4 = arith.constant 0 : index
    %3 = vector.load %arg3[%c0_3, %c0_4] : memref<1x32xf32, #tpu.memory_space<vmem>>, vector<1x32xf32>
    %4 = vector.broadcast %3 : vector<1x32xf32> to vector<8x32xf32>
    %5 = arith.addf %2, %4 : vector<8x32xf32>
    %cst_5 = arith.constant 0.000000e+00 : f32
    %6 = vector.broadcast %cst_5 : f32 to vector<8x32xf32>
    %7 = arith.maximumf %5, %6 : vector<8x32xf32>
    %c0_6 = arith.constant 0 : index
    %c0_7 = arith.constant 0 : index
    %8 = vector.load %arg4[%c0_6, %c0_7] : memref<32x32xf32, #tpu.memory_space<vmem>>, vector<32x32xf32>
    %cst_8 = arith.constant dense<0.000000e+00> : vector<8x32xf32>
    %9 = tpu.matmul %7, %8, %cst_8 {dimension_numbers = #tpu.dot_dimension_numbers<[1], [0], [0], [1], [0, 0, 1, 1], [], []>} : vector<8x32xf32>, vector<32x32xf32>, vector<8x32xf32> -> vector<8x32xf32>
    %c0_9 = arith.constant 0 : index
    %c0_10 = arith.constant 0 : index
    %10 = vector.load %arg5[%c0_9, %c0_10] : memref<1x32xf32, #tpu.memory_space<vmem>>, vector<1x32xf32>
    %11 = vector.broadcast %10 : vector<1x32xf32> to vector<8x32xf32>
    %12 = arith.addf %9, %11 : vector<8x32xf32>
    %cst_11 = arith.constant 0.000000e+00 : f32
    %13 = vector.broadcast %cst_11 : f32 to vector<8x32xf32>
    %14 = arith.maximumf %12, %13 : vector<8x32xf32>
    %c0_12 = arith.constant 0 : index
    %c0_13 = arith.constant 0 : index
    %15 = vector.load %arg6[%c0_12, %c0_13] : memref<32x8xf32, #tpu.memory_space<vmem>>, vector<32x8xf32>
    %cst_14 = arith.constant dense<0.000000e+00> : vector<8x8xf32>
    %16 = tpu.matmul %14, %15, %cst_14 {dimension_numbers = #tpu.dot_dimension_numbers<[1], [0], [0], [1], [0, 0, 1, 1], [], []>} : vector<8x32xf32>, vector<32x8xf32>, vector<8x8xf32> -> vector<8x8xf32>
    %c0_15 = arith.constant 0 : index
    %c0_16 = arith.constant 0 : index
    %17 = vector.load %arg7[%c0_15, %c0_16] : memref<1x8xf32, #tpu.memory_space<vmem>>, vector<1x8xf32>
    %18 = vector.broadcast %17 : vector<1x8xf32> to vector<8x8xf32>
    %19 = arith.addf %16, %18 : vector<8x8xf32>
    %c0_17 = arith.constant 0 : index
    %c0_18 = arith.constant 0 : index
    %20 = vector.load %arg8[%c0_17, %c0_18] : memref<8x8xf32, #tpu.memory_space<vmem>>, vector<8x8xf32>
    tpu.vector_store %arg8[%c0_17, %c0_18], %19 {strides = array<i32>} : memref<8x8xf32, #tpu.memory_space<vmem>>, vector<8x8xf32>,
    return
  }
  func.func @transform_0(%arg0: i32) -> (i32, i32) {
    %c0_i32 = arith.constant 0 : i32
    %c0_i32_0 = arith.constant 0 : i32
    return %arg0, %c0_i32 : i32, i32
  }
  func.func @transform_1(%arg0: i32) -> (i32, i32) {
    %c0_i32 = arith.constant 0 : i32
    %c0_i32_0 = arith.constant 0 : i32
    %c0_i32_1 = arith.constant 0 : i32
    return %c0_i32, %c0_i32_0 : i32, i32
  }
  func.func @transform_2(%arg0: i32) -> (i32, i32) {
    %c0_i32 = arith.constant 0 : i32
    %c0_i32_0 = arith.constant 0 : i32
    %c0_i32_1 = arith.constant 0 : i32
    return %c0_i32, %c0_i32_0 : i32, i32
  }
  func.func @transform_3(%arg0: i32) -> (i32, i32) {
    %c0_i32 = arith.constant 0 : i32
    %c0_i32_0 = arith.constant 0 : i32
    %c0_i32_1 = arith.constant 0 : i32
    return %c0_i32, %c0_i32_0 : i32, i32
  }
  func.func @transform_4(%arg0: i32) -> (i32, i32) {
    %c0_i32 = arith.constant 0 : i32
    %c0_i32_0 = arith.constant 0 : i32
    %c0_i32_1 = arith.constant 0 : i32
    return %c0_i32, %c0_i32_0 : i32, i32
  }
  func.func @transform_5(%arg0: i32) -> (i32, i32) {
    %c0_i32 = arith.constant 0 : i32
    %c0_i32_0 = arith.constant 0 : i32
    %c0_i32_1 = arith.constant 0 : i32
    return %c0_i32, %c0_i32_0 : i32, i32
  }
  func.func @transform_6(%arg0: i32) -> (i32, i32) {
    %c0_i32 = arith.constant 0 : i32
    %c0_i32_0 = arith.constant 0 : i32
    %c0_i32_1 = arith.constant 0 : i32
    return %c0_i32, %c0_i32_0 : i32, i32
  }
  func.func @transform_7(%arg0: i32) -> (i32, i32) {
    %c0_i32 = arith.constant 0 : i32
    %c0_i32_0 = arith.constant 0 : i32
    return %arg0, %c0_i32 : i32, i32
  }
}

</mosaic_0001>

<bundles_post_ra>
// kernel: _mlp_forward_impl.1
= control target key start
LH: loop header
LB: loop body
LE: loop exit
PB: predicated region body
PF: predicated region fallthrough
CT: control target
= control target key end

     0   :  { %12 = vsyncpa [#allocation3], 0  ;;  %s310_s0 = inlined_call_operand.vmem [shape: f32[8,32], index: 0, kind: input, shape index: {}]   ;;  %s311_s1 = inlined_call_operand.vmem [shape: f32[32,32], index: 1, kind: input, shape index: {}]   ;;  %s312_s2 = inlined_call_operand.vmem [shape: f32[1,32], index: 2, kind: input, shape index: {}]   ;;  %s313_s3 = inlined_call_operand.hbm [shape: f32[32,32], index: 3, kind: input, shape index: {}]   ;;  %s314_s4 = inlined_call_operand.vmem [shape: f32[1,32], index: 4, kind: input, shape index: {}]   ;;  %s315_s5 = inlined_call_operand.vmem [shape: f32[32,8], index: 5, kind: input, shape index: {}]   ;;  %s316_s6 = inlined_call_operand.vmem [shape: f32[1,8], index: 6, kind: input, shape index: {}]   ;;  %s317_s7 = inlined_call_operand.hbm [shape: f32[8,8], index: 7, kind: output, shape index: {}]  }
   0x1   :  { %13 = vsyncpa [#allocation4], 0  ;;  %s24_s26 = sshll.u32 %s313_s3, 4  ;;  %s221_s27 = smov [#allocation2]   ;;  %s25_s26 = int_to_ptr.hbm [resolvable:$true] %s24_s26 }
   0x2   :  { %s26_s28 = sshll.u32 %s221_s27, 4  ;;  %s222_s29 = smov 128   ;;  %s27_s28 = int_to_ptr.vmem [resolvable:$true] %s26_s28 }
   0x3   :  { %s223_s30 = smov 8  }
   0x4   :  { %32 = dma.hbm_to_vmem [thread:$0]  %s25_s26, 512, %s27_s28, [#allocation3], %s222_s29, %s222_s29, %s223_s30  }
   0x5   :  { %217 = dma.done.wait [#allocation3], 512  }
   0x6   :  { %218 = vsyncadd [#allocation3], 4294966784  ;;  %v47_v0 = vld [vmem:[%s311_s1 + $0x18] sm:$0xff]  ;;  %v46_v1 = vld [vmem:[%s311_s1 + $0x10] sm:$0xff]  ;;  %vm52_vm0 = vcmask 261120   ;;  %s224_s28 = smov [#allocation5]  }
   0x7   :  { %68 = vmatpush.msra.mxu0 %v47_v0  ;;  %v80_v2 = vld [vmem:[#allocation2 + $0x18] sm:$0xff]  ;;  %v45_v3 = vld [vmem:[%s311_s1 + $0x8] sm:$0xff]  ;;  %v44_v4 = vld [vmem:[%s311_s1] sm:$0xff]  ;;  %s147_s29 = sshll.u32 %s224_s28, 4  ;;  %vm140_vm1 = vcmask 64512   ;;  %s148_s29 = int_to_ptr.vmem [resolvable:$true] %s147_s29 }
   0x8   :  { %100 = vmatpush.msra.mxu1 %v80_v2  ;;  %v43_v5 = vld [vmem:[%s310_s0] sm:$0xff]  ;;  %v79_v6 = vld [vmem:[#allocation2 + $0x10] sm:$0xff]  ;;  %v78_v7 = vld [vmem:[#allocation2 + $0x8] sm:$0xff] }
   0x9   :  { %69 = vmatpush.msra.mxu0 %v46_v1  ;;  %v77_v8 = vld [vmem:[#allocation2] sm:$0xff]  ;;  %v112_v9 = vld [vmem:[%s315_s5 + $0x18] sm:$0xff]  ;;  %v111_v14 = vld [vmem:[%s315_s5 + $0x10] sm:$0xff] }
   0xa   :  { %101 = vmatpush.msra.mxu1 %v79_v6  ;;  %132 = vmatpush.msra.mxu2 %v112_v9  ;;  %v166_v10 = vld [vmem:[%s312_s2] ss:$0 sm:$0xff]  ;;  %v110_v15 = vld [vmem:[%s315_s5 + $0x8] sm:$0xff] }
   0xb   :  { %70 = vmatpush.msra.mxu0 %v45_v3  ;;  %v109_v16 = vld [vmem:[%s315_s5] sm:$0xff]  ;;  %s149_s5 = sshll.u32 %s317_s7, 4  ;;  %s150_s5 = int_to_ptr.hbm [resolvable:$true] %s149_s5 }
   0xc   :  { %102 = vmatpush.msra.mxu1 %v78_v7  ;;  %133 = vmatpush.msra.mxu2 %v111_v14  ;;  %v167_v17 = vld [vmem:[%s314_s4] ss:$0 sm:$0xff] }
   0xd   :  { %71 = vmatpush.msra.mxu0 %v44_v4  ;;  %v168_v21 = vld [vmem:[%s316_s6] ss:$0 sm:$0xff] }
   0xe   :  { %159 = vmatmul.msk.f32.vlgmr.msra.gmra.mxu0 %vm52_vm0, %v43_v5  ;;  %103 = vmatpush.msra.mxu1 %v77_v8 }
   0xf   :  { %134 = vmatpush.msra.mxu2 %v110_v15 }
  0x11   :  { %135 = vmatpush.msra.mxu2 %v109_v16 }
  0x8b   :  { %v73_v11 = vpop.f32.mrf.mxu0 }
  0x8c   :  { %v74_v12 = vadd.f32 %v166_v10, %v73_v11 }
  0x8e   :  { %v76_v13 = vmax.f32 %v74_v12, 0.0 }
  0x90   :  { %160 = vmatmul.msk.f32.vlgmr.msra.gmra.mxu1 %vm52_vm0, %v76_v13 }
 0x10d   :  { %v105_v18 = vpop.f32.mrf.mxu1 }
 0x10e   :  { %v106_v19 = vadd.f32 %v167_v17, %v105_v18 }
 0x110   :  { %v108_v20 = vmax.f32 %v106_v19, 0.0 }
 0x112   :  { %161 = vmatmul.msk.f32.vlgmr.msra.gmra.mxu2 %vm52_vm0, %v108_v20 }
 0x195   :  { %v137_v22 = vpop.f32.mrf.mxu2 }
 0x196   :  { %v138_v23 = vadd.f32 %v168_v21, %v137_v22 }
 0x198   :  { %141 = vst.msk [vmem:[#allocation5] sm:$0xff] %vm140_vm1, %v138_v23 }
 0x199   :  { %152 = dma.vmem_to_hbm [thread:$0]  %s148_s29, 128, %s150_s5, [#allocation4]  }
 0x19a   :  { %219 = dma.done.wait [#allocation4], 128  }
 0x19b   :  { %220 = vsyncadd [#allocation4], 4294967168 }
 0x19c   :  { %157 = vsyncpa [#allocation3], 1 }
 0x19d   :  { %158 = vsyncpa [#allocation4], 1 }

</bundles_post_ra>
